<compile_context>
chip_gen: v6e
topology: v6e:2x2x1
jax: 0.10.0
libtpu: 0.0.40
codegen_flags: <defaults>
</compile_context>

<pallas_src>
import jax
import jax.numpy as jnp
from jax import lax
from jax.experimental import pallas as pl
from jax.experimental.pallas import tpu as pltpu


_SELU_ALPHA = 1.6732632423543772
_SELU_SCALE = 1.0507009873554805
_LN_EPS = 1e-5


def _selu(x):
    # exp(min(x,0)) avoids the inf in the discarded branch of jnp.where.
    neg = _SELU_ALPHA * (jnp.exp(jnp.minimum(x, 0.0)) - 1.0)
    return _SELU_SCALE * jnp.where(x > 0.0, x, neg)


def _env_encoder_kernel(xu_ref, w1a_ref, w2a_ref, w3_ref, rows_ref, o_ref):
    xu = xu_ref[...].astype(jnp.float32)          # (BB, I)
    HI = w1a_ref.shape[-1]                        # H + I
    H = HI - xu.shape[-1]
    O = o_ref.shape[-1]

    # Packed parameter rows: [b1_aug, g1, be1, b2_aug, g2, be2, b3_pad, 0]
    b1 = rows_ref[0:1, :]
    g1 = rows_ref[1:2, :]
    be1 = rows_ref[2:3, :]
    b2 = rows_ref[3:4, :]
    g2 = rows_ref[4:5, :]
    be2 = rows_ref[5:6, :]
    b3 = rows_ref[6:7, :][:, :O]

    lane = lax.broadcasted_iota(jnp.int32, (1, HI), 1)
    is_h = lane < H                               # SELU only on the hidden lanes
    inv_n = 1.0 / float(HI)

    def layernorm(v, g, b):
        mu = jnp.sum(v, axis=-1, keepdims=True) * inv_n
        d = v - mu
        var = jnp.sum(d * d, axis=-1, keepdims=True) * inv_n
        return d * lax.rsqrt(var + _LN_EPS) * g + b

    # z1 = [l1(xu) | xu]  (identity-augmented w1, one MXU push)
    z1 = jnp.dot(xu, w1a_ref[...], preferred_element_type=jnp.float32) + b1
    # concat([SELU(l1(xu)), xu]) -> LayerNorm1
    c1 = layernorm(jnp.where(is_h, _selu(z1), z1), g1, be1)
    # l2 over the concat (zero-padded output lanes); xu re-injected from z1
    z2 = jnp.dot(c1, w2a_ref[...], preferred_element_type=jnp.float32) + b2
    c2 = layernorm(jnp.where(is_h, _selu(z2), z1), g2, be2)
    # l3
    out = jnp.dot(c2, w3_ref[...], preferred_element_type=jnp.float32) + b3
    o_ref[...] = out.astype(o_ref.dtype)


def env_encoder(xu, params, *, block_rows=None):
    """ENVEncoder forward (resnet=True).

    xu: (B, in_dim).  params (PyTorch layout):
      w1 (H, I), b1 (H,), w2 (H, H+I), b2 (H,), w3 (O, H+I), b3 (O,),
      ln1_g / ln1_b / ln2_g / ln2_b (H+I,).
    block_rows=None -> whole batch in one grid step (best on v5e/v6e and small B);
    pass block_rows ~= B/2 (a divisor of B) on v7x to feed both TensorCores.
    """
    B, I = xu.shape
    H = params["w1"].shape[0]
    O = params["w3"].shape[0]
    HI = H + I
    assert params["w1"].shape == (H, I)
    assert params["w2"].shape == (H, HI)
    assert params["w3"].shape == (O, HI)

    # Partial blocks must be sublane-aligned for the input dtype (8 rows for
    # f32, 16 for bf16, 32 for int8/fp8).
    sub = max(8, 32 // jnp.dtype(xu.dtype).itemsize)
    if block_rows is None or block_rows >= B:
        block_rows = B
    else:
        block_rows = max(sub, ((block_rows + sub - 1) // sub) * sub)
    nb = pl.cdiv(B, block_rows)
    Bp = nb * block_rows
    # No pad/slice round trip unless block_rows does not divide B.
    xu_p = xu if Bp == B else jnp.pad(xu, ((0, Bp - B), (0, 0)))

    f32 = jnp.float32
    # One-time wrapper-side weight re-layout:
    #   w1_aug = [w1.T | I]        -> xu @ w1_aug   = [l1_pre(xu) | xu]
    #   w2_aug = [w2.T | 0]        -> c1 @ w2_aug   = [l2_pre(c1) | 0]
    #   w3t    =  w3.T
    w1a = jnp.concatenate([params["w1"].T.astype(f32), jnp.eye(I, dtype=f32)],
                          axis=1)                               # (I, HI)
    w2a = jnp.concatenate([params["w2"].T.astype(f32),
                           jnp.zeros((HI, I), f32)], axis=1)    # (HI, HI)
    w3t = params["w3"].T.astype(f32)                            # (HI, O)

    def _row(v, n):
        r = jnp.zeros((HI,), f32)
        return r.at[:n].set(v.astype(f32))

    # All small parameter rows packed into ONE array -> one DMA descriptor.
    rows = jnp.stack([
        _row(params["b1"], H),                    # b1 padded with zeros (xu lanes)
        params["ln1_g"].astype(f32),
        params["ln1_b"].astype(f32),
        _row(params["b2"], H),                    # b2 padded with zeros
        params["ln2_g"].astype(f32),
        params["ln2_b"].astype(f32),
        _row(params["b3"], O),                    # b3 padded with zeros
        jnp.zeros((HI,), f32),                    # sublane padding row
    ], axis=0)                                    # (8, HI)

    def _bcast(shape):
        return pl.BlockSpec(shape, lambda i: (0,) * len(shape))

    out = pl.pallas_call(
        _env_encoder_kernel,
        out_shape=jax.ShapeDtypeStruct((Bp, O), xu.dtype),
        grid_spec=pl.GridSpec(
            grid=(nb,),
            in_specs=[
                pl.BlockSpec((block_rows, I), lambda i: (i, 0)),   # xu
                _bcast((I, HI)),                                   # w1_aug
                _bcast((HI, HI)),                                  # w2_aug
                _bcast((HI, O)),                                   # w3t
                _bcast((8, HI)),                                   # packed rows
            ],
            out_specs=pl.BlockSpec((block_rows, O), lambda i: (i, 0)),
        ),
        compiler_params=pltpu.CompilerParams(
            dimension_semantics=("parallel",)),
    )(xu_p, w1a, w2a, w3t, rows)
    return out[:B] if Bp != B else out


# ---------------- pure-JAX reference (for correctness check) ----------------
def ref_forward(xu, p):
    hp = lax.Precision.HIGHEST

    def ln(v, g, b):
        mu = jnp.mean(v, axis=-1, keepdims=True)
        var = jnp.mean(jnp.square(v - mu), axis=-1, keepdims=True)
        return (v - mu) / jnp.sqrt(var + _LN_EPS) * g + b

    h = jax.nn.selu(jnp.dot(xu, p["w1"].T, precision=hp) + p["b1"])
    c = ln(jnp.concatenate([h, xu], axis=1), p["ln1_g"], p["ln1_b"])
    h = jax.nn.selu(jnp.dot(c, p["w2"].T, precision=hp) + p["b2"])
    c = ln(jnp.concatenate([h, xu], axis=1), p["ln2_g"], p["ln2_b"])
    return jnp.dot(c, p["w3"].T, precision=hp) + p["b3"]


if __name__ == "__main__":
    B, in_dim, hidden_dim, out_dim = 4, 24, 32, 16
    key = jax.random.PRNGKey(0)
    ks = jax.random.split(key, 11)

    def xavier_uniform(k, shape):
        fan_out, fan_in = shape
        a = float(jnp.sqrt(6.0 / (fan_in + fan_out)))
        return jax.random.uniform(k, shape, jnp.float32, -a, a)

    params = {
        "w1": xavier_uniform(ks[0], (hidden_dim, in_dim)),
        "b1": 0.1 * jax.random.normal(ks[1], (hidden_dim,), jnp.float32),
        "w2": xavier_uniform(ks[2], (hidden_dim, hidden_dim + in_dim)),
        "b2": 0.1 * jax.random.normal(ks[3], (hidden_dim,), jnp.float32),
        "w3": xavier_uniform(ks[4], (out_dim, hidden_dim + in_dim)),
        "b3": 0.1 * jax.random.normal(ks[5], (out_dim,), jnp.float32),
        "ln1_g": 1.0 + 0.1 * jax.random.normal(ks[6], (hidden_dim + in_dim,), jnp.float32),
        "ln1_b": 0.1 * jax.random.normal(ks[7], (hidden_dim + in_dim,), jnp.float32),
        "ln2_g": 1.0 + 0.1 * jax.random.normal(ks[8], (hidden_dim + in_dim,), jnp.float32),
        "ln2_b": 0.1 * jax.random.normal(ks[9], (hidden_dim + in_dim,), jnp.float32),
    }
    xu = jax.random.normal(ks[10], (B, in_dim), jnp.float32)

    out = env_encoder(xu, params)
    out = jax.block_until_ready(out)

    ref = ref_forward(xu, params)
    assert out.shape == (B, out_dim), out.shape
    err = float(jnp.max(jnp.abs(out - ref)))
    assert err < 1e-4, err
    print("KERNEL_OK")
</pallas_src>

<mosaic_0001>
module attributes {stable_mosaic.version = 11 : i64} {
  func.func @_env_encoder_kernel(%arg0: i32, %arg1: memref<4x24xf32, #tpu.memory_space<vmem>>, %arg2: memref<24x56xf32, #tpu.memory_space<vmem>>, %arg3: memref<56x56xf32, #tpu.memory_space<vmem>>, %arg4: memref<56x16xf32, #tpu.memory_space<vmem>>, %arg5: memref<8x56xf32, #tpu.memory_space<vmem>>, %arg6: memref<4x16xf32, #tpu.memory_space<vmem>>) attributes {dimension_semantics = [#tpu.dimension_semantics<parallel>], iteration_bounds = array<i64: 1>, scalar_prefetch = 0 : i64, scratch_operands = 0 : i64, tpu.core_type = #tpu.core_type<tc>, window_params = [{transform_indices = @transform_0, window_bounds = array<i64: 4, 24>}, {pipeline_mode = #tpu.pipeline_mode<synchronous>, transform_indices = @transform_1, window_bounds = array<i64: 24, 56>}, {pipeline_mode = #tpu.pipeline_mode<synchronous>, transform_indices = @transform_2, window_bounds = array<i64: 56, 56>}, {pipeline_mode = #tpu.pipeline_mode<synchronous>, transform_indices = @transform_3, window_bounds = array<i64: 56, 16>}, {pipeline_mode = #tpu.pipeline_mode<synchronous>, transform_indices = @transform_4, window_bounds = array<i64: 8, 56>}, {transform_indices = @transform_5, window_bounds = array<i64: 4, 16>}]} {
    %c0 = arith.constant 0 : index
    %c0_0 = arith.constant 0 : index
    %0 = vector.load %arg1[%c0, %c0_0] : memref<4x24xf32, #tpu.memory_space<vmem>>, vector<4x24xf32>
    %c0_1 = arith.constant 0 : index
    %c0_2 = arith.constant 0 : index
    %1 = vector.load %arg5[%c0_1, %c0_2] : memref<8x56xf32, #tpu.memory_space<vmem>>, vector<1x56xf32>
    %c1 = arith.constant 1 : index
    %c0_3 = arith.constant 0 : index
    %2 = vector.load %arg5[%c1, %c0_3] : memref<8x56xf32, #tpu.memory_space<vmem>>, vector<1x56xf32>
    %c2 = arith.constant 2 : index
    %c0_4 = arith.constant 0 : index
    %3 = vector.load %arg5[%c2, %c0_4] : memref<8x56xf32, #tpu.memory_space<vmem>>, vector<1x56xf32>
    %c3 = arith.constant 3 : index
    %c0_5 = arith.constant 0 : index
    %4 = vector.load %arg5[%c3, %c0_5] : memref<8x56xf32, #tpu.memory_space<vmem>>, vector<1x56xf32>
    %c4 = arith.constant 4 : index
    %c0_6 = arith.constant 0 : index
    %5 = vector.load %arg5[%c4, %c0_6] : memref<8x56xf32, #tpu.memory_space<vmem>>, vector<1x56xf32>
    %c5 = arith.constant 5 : index
    %c0_7 = arith.constant 0 : index
    %6 = vector.load %arg5[%c5, %c0_7] : memref<8x56xf32, #tpu.memory_space<vmem>>, vector<1x56xf32>
    %c6 = arith.constant 6 : index
    %c0_8 = arith.constant 0 : index
    %7 = vector.load %arg5[%c6, %c0_8] : memref<8x56xf32, #tpu.memory_space<vmem>>, vector<1x56xf32>
    %8 = vector.extract_strided_slice %7 {offsets = [0, 0], sizes = [1, 16], strides = [1, 1]} : vector<1x56xf32> to vector<1x16xf32>
    %9 = tpu.iota {dimensions = array<i32: 1>} : vector<1x56xi32>
    %c32_i32 = arith.constant 32 : i32
    %10 = vector.broadcast %c32_i32 : i32 to vector<1x56xi32>
    %11 = arith.cmpi slt, %9, %10 : vector<1x56xi32>
    %c0_9 = arith.constant 0 : index
    %c0_10 = arith.constant 0 : index
    %12 = vector.load %arg2[%c0_9, %c0_10] : memref<24x56xf32, #tpu.memory_space<vmem>>, vector<24x56xf32>
    %cst = arith.constant dense<0.000000e+00> : vector<4x56xf32>
    %13 = tpu.matmul %0, %12, %cst {dimension_numbers = #tpu.dot_dimension_numbers<[1], [0], [0], [1], [0, 0, 1, 1], [], []>} : vector<4x24xf32>, vector<24x56xf32>, vector<4x56xf32> -> vector<4x56xf32>
    %14 = vector.broadcast %1 : vector<1x56xf32> to vector<4x56xf32>
    %15 = arith.addf %13, %14 : vector<4x56xf32>
    %cst_11 = arith.constant 0.000000e+00 : f32
    %16 = vector.broadcast %cst_11 : f32 to vector<4x56xf32>
    %17 = arith.minimumf %15, %16 : vector<4x56xf32>
    %18 = math.exp %17 : vector<4x56xf32>
    %cst_12 = arith.constant 1.000000e+00 : f32
    %19 = vector.broadcast %cst_12 : f32 to vector<4x56xf32>
    %20 = arith.subf %18, %19 : vector<4x56xf32>
    %cst_13 = arith.constant 1.67326319 : f32
    %21 = vector.broadcast %cst_13 : f32 to vector<4x56xf32>
    %22 = arith.mulf %21, %20 : vector<4x56xf32>
    %cst_14 = arith.constant 0.000000e+00 : f32
    %23 = vector.broadcast %cst_14 : f32 to vector<4x56xf32>
    %24 = arith.cmpf ogt, %15, %23 : vector<4x56xf32>
    %25 = arith.select %24, %15, %22 : vector<4x56xi1>, vector<4x56xf32>
    %cst_15 = arith.constant 1.05070102 : f32
    %26 = vector.broadcast %cst_15 : f32 to vector<4x56xf32>
    %27 = arith.mulf %26, %25 : vector<4x56xf32>
    %28 = vector.shape_cast %11 : vector<1x56xi1> to vector<1x56xi1>
    %29 = vector.broadcast %28 : vector<1x56xi1> to vector<4x56xi1>
    %30 = arith.select %29, %27, %15 : vector<4x56xi1>, vector<4x56xf32>
    %cst_16 = arith.constant dense<0.000000e+00> : vector<4xf32>
    %31 = vector.multi_reduction <add>, %30, %cst_16 [1] : vector<4x56xf32> to vector<4xf32>
    %32 = vector.shape_cast %31 : vector<4xf32> to vector<4x1xf32>
    %cst_17 = arith.constant 0.0178571437 : f32
    %33 = vector.broadcast %cst_17 : f32 to vector<4x1xf32>
    %34 = arith.mulf %32, %33 : vector<4x1xf32>
    %35 = vector.broadcast %34 : vector<4x1xf32> to vector<4x56xf32>
    %36 = arith.subf %30, %35 : vector<4x56xf32>
    %37 = arith.mulf %36, %36 : vector<4x56xf32>
    %cst_18 = arith.constant dense<0.000000e+00> : vector<4xf32>
    %38 = vector.multi_reduction <add>, %37, %cst_18 [1] : vector<4x56xf32> to vector<4xf32>
    %39 = vector.shape_cast %38 : vector<4xf32> to vector<4x1xf32>
    %cst_19 = arith.constant 0.0178571437 : f32
    %40 = vector.broadcast %cst_19 : f32 to vector<4x1xf32>
    %41 = arith.mulf %39, %40 : vector<4x1xf32>
    %cst_20 = arith.constant 9.99999974E-6 : f32
    %42 = vector.broadcast %cst_20 : f32 to vector<4x1xf32>
    %43 = arith.addf %41, %42 : vector<4x1xf32>
    %44 = math.rsqrt %43 : vector<4x1xf32>
    %45 = vector.broadcast %44 : vector<4x1xf32> to vector<4x56xf32>
    %46 = arith.mulf %36, %45 : vector<4x56xf32>
    %47 = vector.broadcast %2 : vector<1x56xf32> to vector<4x56xf32>
    %48 = arith.mulf %46, %47 : vector<4x56xf32>
    %49 = vector.broadcast %3 : vector<1x56xf32> to vector<4x56xf32>
    %50 = arith.addf %48, %49 : vector<4x56xf32>
    %c0_21 = arith.constant 0 : index
    %c0_22 = arith.constant 0 : index
    %51 = vector.load %arg3[%c0_21, %c0_22] : memref<56x56xf32, #tpu.memory_space<vmem>>, vector<56x56xf32>
    %cst_23 = arith.constant dense<0.000000e+00> : vector<4x56xf32>
    %52 = tpu.matmul %50, %51, %cst_23 {dimension_numbers = #tpu.dot_dimension_numbers<[1], [0], [0], [1], [0, 0, 1, 1], [], []>} : vector<4x56xf32>, vector<56x56xf32>, vector<4x56xf32> -> vector<4x56xf32>
    %53 = vector.broadcast %4 : vector<1x56xf32> to vector<4x56xf32>
    %54 = arith.addf %52, %53 : vector<4x56xf32>
    %cst_24 = arith.constant 0.000000e+00 : f32
    %55 = vector.broadcast %cst_24 : f32 to vector<4x56xf32>
    %56 = arith.minimumf %54, %55 : vector<4x56xf32>
    %57 = math.exp %56 : vector<4x56xf32>
    %cst_25 = arith.constant 1.000000e+00 : f32
    %58 = vector.broadcast %cst_25 : f32 to vector<4x56xf32>
    %59 = arith.subf %57, %58 : vector<4x56xf32>
    %cst_26 = arith.constant 1.67326319 : f32
    %60 = vector.broadcast %cst_26 : f32 to vector<4x56xf32>
    %61 = arith.mulf %60, %59 : vector<4x56xf32>
    %cst_27 = arith.constant 0.000000e+00 : f32
    %62 = vector.broadcast %cst_27 : f32 to vector<4x56xf32>
    %63 = arith.cmpf ogt, %54, %62 : vector<4x56xf32>
    %64 = arith.select %63, %54, %61 : vector<4x56xi1>, vector<4x56xf32>
    %cst_28 = arith.constant 1.05070102 : f32
    %65 = vector.broadcast %cst_28 : f32 to vector<4x56xf32>
    %66 = arith.mulf %65, %64 : vector<4x56xf32>
    %67 = vector.shape_cast %11 : vector<1x56xi1> to vector<1x56xi1>
    %68 = vector.broadcast %67 : vector<1x56xi1> to vector<4x56xi1>
    %69 = arith.select %68, %66, %15 : vector<4x56xi1>, vector<4x56xf32>
    %cst_29 = arith.constant dense<0.000000e+00> : vector<4xf32>
    %70 = vector.multi_reduction <add>, %69, %cst_29 [1] : vector<4x56xf32> to vector<4xf32>
    %71 = vector.shape_cast %70 : vector<4xf32> to vector<4x1xf32>
    %cst_30 = arith.constant 0.0178571437 : f32
    %72 = vector.broadcast %cst_30 : f32 to vector<4x1xf32>
    %73 = arith.mulf %71, %72 : vector<4x1xf32>
    %74 = vector.broadcast %73 : vector<4x1xf32> to vector<4x56xf32>
    %75 = arith.subf %69, %74 : vector<4x56xf32>
    %76 = arith.mulf %75, %75 : vector<4x56xf32>
    %cst_31 = arith.constant dense<0.000000e+00> : vector<4xf32>
    %77 = vector.multi_reduction <add>, %76, %cst_31 [1] : vector<4x56xf32> to vector<4xf32>
    %78 = vector.shape_cast %77 : vector<4xf32> to vector<4x1xf32>
    %cst_32 = arith.constant 0.0178571437 : f32
    %79 = vector.broadcast %cst_32 : f32 to vector<4x1xf32>
    %80 = arith.mulf %78, %79 : vector<4x1xf32>
    %cst_33 = arith.constant 9.99999974E-6 : f32
    %81 = vector.broadcast %cst_33 : f32 to vector<4x1xf32>
    %82 = arith.addf %80, %81 : vector<4x1xf32>
    %83 = math.rsqrt %82 : vector<4x1xf32>
    %84 = vector.broadcast %83 : vector<4x1xf32> to vector<4x56xf32>
    %85 = arith.mulf %75, %84 : vector<4x56xf32>
    %86 = vector.broadcast %5 : vector<1x56xf32> to vector<4x56xf32>
    %87 = arith.mulf %85, %86 : vector<4x56xf32>
    %88 = vector.broadcast %6 : vector<1x56xf32> to vector<4x56xf32>
    %89 = arith.addf %87, %88 : vector<4x56xf32>
    %c0_34 = arith.constant 0 : index
    %c0_35 = arith.constant 0 : index
    %90 = vector.load %arg4[%c0_34, %c0_35] : memref<56x16xf32, #tpu.memory_space<vmem>>, vector<56x16xf32>
    %cst_36 = arith.constant dense<0.000000e+00> : vector<4x16xf32>
    %91 = tpu.matmul %89, %90, %cst_36 {dimension_numbers = #tpu.dot_dimension_numbers<[1], [0], [0], [1], [0, 0, 1, 1], [], []>} : vector<4x56xf32>, vector<56x16xf32>, vector<4x16xf32> -> vector<4x16xf32>
    %92 = vector.broadcast %8 : vector<1x16xf32> to vector<4x16xf32>
    %93 = arith.addf %91, %92 : vector<4x16xf32>
    %c0_37 = arith.constant 0 : index
    %c0_38 = arith.constant 0 : index
    %94 = vector.load %arg6[%c0_37, %c0_38] : memref<4x16xf32, #tpu.memory_space<vmem>>, vector<4x16xf32>
    tpu.vector_store %arg6[%c0_37, %c0_38], %93 {strides = array<i32>} : memref<4x16xf32, #tpu.memory_space<vmem>>, vector<4x16xf32>,
    return
  }
  func.func @transform_0(%arg0: i32) -> (i32, i32) {
    %c0_i32 = arith.constant 0 : i32
    %c0_i32_0 = arith.constant 0 : i32
    return %arg0, %c0_i32 : i32, i32
  }
  func.func @transform_1(%arg0: i32) -> (i32, i32) {
    %c0_i32 = arith.constant 0 : i32
    %c0_i32_0 = arith.constant 0 : i32
    %c0_i32_1 = arith.constant 0 : i32
    return %c0_i32, %c0_i32_0 : i32, i32
  }
  func.func @transform_2(%arg0: i32) -> (i32, i32) {
    %c0_i32 = arith.constant 0 : i32
    %c0_i32_0 = arith.constant 0 : i32
    %c0_i32_1 = arith.constant 0 : i32
    return %c0_i32, %c0_i32_0 : i32, i32
  }
  func.func @transform_3(%arg0: i32) -> (i32, i32) {
    %c0_i32 = arith.constant 0 : i32
    %c0_i32_0 = arith.constant 0 : i32
    %c0_i32_1 = arith.constant 0 : i32
    return %c0_i32, %c0_i32_0 : i32, i32
  }
  func.func @transform_4(%arg0: i32) -> (i32, i32) {
    %c0_i32 = arith.constant 0 : i32
    %c0_i32_0 = arith.constant 0 : i32
    %c0_i32_1 = arith.constant 0 : i32
    return %c0_i32, %c0_i32_0 : i32, i32
  }
  func.func @transform_5(%arg0: i32) -> (i32, i32) {
    %c0_i32 = arith.constant 0 : i32
    %c0_i32_0 = arith.constant 0 : i32
    return %arg0, %c0_i32 : i32, i32
  }
}

</mosaic_0001>

<bundles_post_ra>
// kernel: tpu_custom_call.1
= control target key start
LH: loop header
LB: loop body
LE: loop exit
PB: predicated region body
PF: predicated region fallthrough
CT: control target
= control target key end

     0   :  { %10 = vsyncpa [#allocation3], 0  ;;  %s664_s0 = inlined_call_operand.vmem [shape: f32[4,24], index: 0, kind: input, shape index: {}]   ;;  %s665_s1 = inlined_call_operand.hbm [shape: f32[24,56], index: 1, kind: input, shape index: {}]   ;;  %s666_s2 = inlined_call_operand.vmem [shape: f32[56,56], index: 2, kind: input, shape index: {}]   ;;  %s667_s3 = inlined_call_operand.vmem [shape: f32[56,16], index: 3, kind: input, shape index: {}]   ;;  %s668_s4 = inlined_call_operand.vmem [shape: f32[8,56], index: 4, kind: input, shape index: {}]   ;;  %s669_s5 = inlined_call_operand.hbm [shape: f32[4,16], index: 5, kind: output, shape index: {}]  }
   0x1   :  { %11 = vsyncpa [#allocation4], 0  ;;  %s513_s18 = smov [#allocation2]  }
   0x2   :  { %s19_s19 = sshll.u32 %s513_s18, 4  ;;  %s20_s19 = int_to_ptr.vmem [resolvable:$true] %s19_s19 }
   0x3   :  { %s477_s20 = scalar_lea.vmem %s20_s19, 384  ;;  %p482_p1 = scmp.lt.s32.totalorder %s20_s19, %s20_s19 }
   0x4   :  { %p478_p0 = scmp.ne.s32.totalorder %s20_s19, %s477_s20  ;;  %p483_p2 = scmp.lt.s32.totalorder %s477_s20, %s477_s20 }
   0x6   :  { %p484_p3 = por %p483_p2, %p482_p1 }
   0x8   :  { %p485_p4 = pnand %p484_p3, %p478_p0 }
   0xa   :  { %488 = shalt.err (!%p485_p4)
}
   0xb   :  { %s514_s21 = smov 128   ;;  %s515_s22 = smov 8  }
   0xc   :  { %25 = dma.hbm_to_vmem [thread:$0]  %s665_s1, 384, %s20_s19, [#allocation3], %s514_s21, %s514_s21, %s515_s22  }
   0xd   :  { %509 = dma.done.wait [#allocation3], 384  }
   0xe   :  { %510 = vsyncadd [#allocation3], 4294966912  ;;  %v516_v0 = vmov 0.0   ;;  %vm517_vm0 = vmmov 0   ;;  %v48_v1 = vld [vmem:[#allocation2 + $0x10] sm:$0xff]  ;;  %v47_v2 = vld [vmem:[#allocation2 + $0x8] sm:$0xff]  ;;  %v43_v11 = vlaneseq }
   0xf   :  { %412 = vmatprep.subr.mxu0 %v516_v0  ;;  %418 = vmatprep.mubr.msk.f32.mxu0 %vm517_vm0, %v516_v0  ;;  %v46_v3 = vld [vmem:[#allocation2] sm:$0xff]  ;;  %vm53_vm1 = vcmask 195584   ;;  %vm138_vm4 = vcmask 453632   ;;  %v168_v25 = vld [vmem:[%s666_s2 + $0x30] sm:$0xff]  ;;  %v167_v26 = vld [vmem:[%s666_s2 + $0x28] sm:$0xff]  ;;  %vm173_vm5 = vcmask 457728  }
  0x10   :  { %421 = vmatprep.subr.mxu1 %v516_v0  ;;  %435 = vmatprep.mubr.msk.f32.mxu1 %vm517_vm0, %v516_v0  ;;  %v35_v4 = vld [vmem:[%s664_s0] sm:$0xf]  ;;  %v572_v13 = vand.u32 127, %v43_v11  ;;  %v165_v28 = vld [vmem:[%s666_s2 + $0x18] sm:$0xff]  ;;  %v164_v29 = vld [vmem:[%s666_s2 + $0x10] sm:$0xff]  ;;  %s518_s13 = smov [#allocation5]  }
  0x11   :  { %413 = vmatpush3.msra.mxu0 %v48_v1  ;;  %v380_v5 = vld [vmem:[%s668_s4] ss:$0 sm:$0xff]  ;;  %422 = vmatpush3.msra.mxu1 %v168_v25  ;;  %v163_v30 = vld [vmem:[%s666_s2 + $0x8] sm:$0xff]  ;;  %v383_v36 = vld [vmem:[%s668_s4 + $0x1] ss:$0 sm:$0xff]  ;;  %s371_s14 = sshll.u32 %s518_s13, 4  ;;  %s372_s14 = int_to_ptr.vmem [resolvable:$true] %s371_s14 }
  0x12   :  { %414 = vmatprep.subr.mxu0 %v516_v0  ;;  %vm45_vm3 = vcmp.lt.s32.totalorder %v572_v13, 32  ;;  %423 = vmatprep.subr.mxu1 %v516_v0  ;;  %v166_v27 = vld [vmem:[%s666_s2 + $0x20] sm:$0xff]  ;;  %v285_v59 = vld [vmem:[%s667_s3 + $0x30] sm:$0xff]  ;;  %v284_v60 = vld [vmem:[%s667_s3 + $0x28] sm:$0xff]  ;;  %vm363_vm7 = vcmask 125952   ;;  %s489_s15 = scalar_lea.vmem %s372_s14, 64  ;;  %p494_p6 = scmp.lt.s32.totalorder %s372_s14, %s372_s14 }
  0x13   :  { %415 = vmatpush3.msra.mxu0 %v47_v2  ;;  %424 = vmatpush3.msra.mxu1 %v167_v26  ;;  %v162_v31 = vld [vmem:[%s666_s2] sm:$0xff]  ;;  %v282_v62 = vld [vmem:[%s667_s3 + $0x18] sm:$0xff]  ;;  %v281_v63 = vld [vmem:[%s667_s3 + $0x10] sm:$0xff]  ;;  %p490_p5 = scmp.ne.s32.totalorder %s372_s14, %s489_s15  ;;  %p495_p7 = scmp.lt.s32.totalorder %s489_s15, %s489_s15 }
  0x14   :  { %416 = vmatprep.subr.mxu0 %v516_v0  ;;  %425 = vmatprep.subr.mxu1 %v516_v0  ;;  %v384_v38 = vld [vmem:[%s668_s4 + $0x2] ss:$0 sm:$0xff]  ;;  %v385_v41 = vld [vmem:[%s668_s4 + $0x3] ss:$0 sm:$0xff]  ;;  %v280_v1 = vld [vmem:[%s667_s3 + $0x8] sm:$0xff] }
  0x15   :  { %417 = vmatpush3.msra.mxu0 %v46_v3  ;;  %426 = vmatpush3.msra.mxu1 %v166_v27  ;;  %v283_v61 = vld [vmem:[%s667_s3 + $0x20] sm:$0xff]  ;;  %p496_p8 = por %p495_p7, %p494_p6 }
  0x16   :  { %419 = vmatmul.mubr.msk.f32.vlgmr.msra.gmra.mxu0 %vm53_vm1, %v35_v4  ;;  %438 = vmatprep.subr.mxu0 %v516_v0  ;;  %v279_v2 = vld [vmem:[%s667_s3] sm:$0xff] }
  0x17   :  { %452 = vmatprep.mubr.msk.f32.mxu0 %vm517_vm0, %v516_v0  ;;  %427 = vmatprep.subr.mxu1 %v516_v0  ;;  %p497_p9 = pnand %p496_p8, %p490_p5 }
  0x18   :  { %428 = vmatpush3.msra.mxu1 %v165_v28  ;;  %439 = vmatpush3.msra.mxu0 %v285_v59 }
  0x19   :  { %429 = vmatprep.subr.mxu1 %v516_v0  ;;  %440 = vmatprep.subr.mxu0 %v516_v0 }
  0x1a   :  { %430 = vmatpush3.msra.mxu1 %v164_v29  ;;  %441 = vmatpush3.msra.mxu0 %v284_v60 }
  0x1b   :  { %431 = vmatprep.subr.mxu1 %v516_v0  ;;  %442 = vmatprep.subr.mxu0 %v516_v0 }
  0x1c   :  { %432 = vmatpush3.msra.mxu1 %v163_v30  ;;  %443 = vmatpush3.msra.mxu0 %v283_v61 }
  0x1d   :  { %433 = vmatprep.subr.mxu1 %v516_v0  ;;  %444 = vmatprep.subr.mxu0 %v516_v0 }
  0x1e   :  { %434 = vmatpush3.msra.mxu1 %v162_v31  ;;  %445 = vmatpush3.msra.mxu0 %v282_v62 }
  0x1f   :  { %446 = vmatprep.subr.mxu0 %v516_v0 }
  0x20   :  { %447 = vmatpush3.msra.mxu0 %v281_v63 }
  0x21   :  { %448 = vmatprep.subr.mxu0 %v516_v0 }
  0x22   :  { %449 = vmatpush3.msra.mxu0 %v280_v1 }
  0x23   :  { %450 = vmatprep.subr.mxu0 %v516_v0  ;;  %v390_v0 = vld [vmem:[%s668_s4 + $0x6] ss:$0 sm:$0xff] }
  0x24   :  { %451 = vmatpush3.msra.mxu0 %v279_v2 }
  0xd6   :  { %v123_v6 = vpop.f32.mrf.mxu0 }
  0xd7   :  { %v569_v7 = vadd.f32 %v380_v5, %v123_v6 }
  0xd8   :  { %v420_v8 = vpop.f32.mrf.mxu0 }
  0xd9   :  { %v127_v9 = vmin.f32 %v569_v7, 0.0  ;;  %vm132_vm2 = vcmp.gt.f32.partialorder %v569_v7, 0.0 }
  0xdb   :  { %v128_v10 = vmul.f32 1.442695, %v127_v9  ;;  %v389_v9 = vld [vmem:[%s668_s4 + $0x5] ss:$0 sm:$0xff] }
  0xdd   :  { %461 = vpow2.f32 %v128_v10 }
  0xea   :  { %v462_v12 = vpop.eup %461 }
  0xeb   :  { %v382_v14 = vadd.f32 -1.0, %v462_v12 }
  0xed   :  { %v131_v15 = vmul.f32 1.6732632, %v382_v14 }
  0xef   :  { %v133_v16 = vsel %vm132_vm2, %v569_v7, %v131_v15 }
  0xf0   :  { %v134_v17 = vmul.f32 1.050701, %v133_v16 }
  0xf2   :  { %v137_v18 = vsel %vm45_vm3, %v134_v17, %v569_v7 }
  0xf3   :  { %v139_v19 = vsel %vm138_vm4, %v137_v18, 0.0 }
  0xf4   :  { %140 = vadd.xlane.f32.xlu0 %v139_v19 }
 0x17d   :  { %v141_v20 = vpop.xlane.xlu0 %140 }
 0x17e   :  { %v142_v21 = vmul.f32 0.017857144, %v141_v20 }
 0x180   :  { %v143_v22 = vsub.f32 %v137_v18, %v142_v21 }
 0x182   :  { %v144_v23 = vmul.f32 %v143_v22, %v143_v22 }
 0x184   :  { %v145_v24 = vsel %vm138_vm4, %v144_v23, 0.0 }
 0x185   :  { %146 = vadd.xlane.f32.xlu0 %v145_v24 }
 0x20e   :  { %v147_v32 = vpop.xlane.xlu0 %146 }
 0x20f   :  { %v148_v33 = vmul.f32 0.017857144, %v147_v32 }
 0x211   :  { %v149_v34 = vadd.f32 1e-05, %v148_v33 }
 0x213   :  { %463 = vrsqrt.f32 %v149_v34 }
 0x220   :  { %v464_v35 = vpop.eup %463 }
 0x221   :  { %v151_v37 = vmul.f32 %v464_v35, %v143_v22 }
 0x223   :  { %v156_v39 = vmul.f32 %v383_v36, %v151_v37 }
 0x225   :  { %v161_v40 = vadd.f32 %v384_v38, %v156_v39 }
 0x227   :  { %436 = vmatmul.mubr.msk.f32.vlgmr.msra.gmra.mxu1 %vm173_vm5, %v161_v40 }
 0x2e7   :  { %v243_v42 = vpop.f32.mrf.mxu1 }
 0x2e8   :  { %v244_v43 = vadd.f32 %v385_v41, %v243_v42 }
 0x2e9   :  { %v437_v44 = vpop.f32.mrf.mxu1 }
 0x2ea   :  { %v247_v45 = vmin.f32 %v244_v43, 0.0  ;;  %vm252_vm6 = vcmp.gt.f32.partialorder %v244_v43, 0.0 }
 0x2ec   :  { %v248_v46 = vmul.f32 1.442695, %v247_v45 }
 0x2ee   :  { %465 = vpow2.f32 %v248_v46 }
 0x2fb   :  { %v466_v47 = vpop.eup %465 }
 0x2fc   :  { %v387_v48 = vadd.f32 -1.0, %v466_v47 }
 0x2fe   :  { %v251_v49 = vmul.f32 1.6732632, %v387_v48 }
 0x300   :  { %v253_v50 = vsel %vm252_vm6, %v244_v43, %v251_v49 }
 0x301   :  { %v254_v51 = vmul.f32 1.050701, %v253_v50 }
 0x303   :  { %v255_v52 = vsel %vm45_vm3, %v254_v51, %v569_v7  ;;  %v388_v7 = vld [vmem:[%s668_s4 + $0x4] ss:$0 sm:$0xff] }
 0x304   :  { %v256_v53 = vsel %vm138_vm4, %v255_v52, 0.0 }
 0x305   :  { %257 = vadd.xlane.f32.xlu1 %v256_v53 }
 0x38e   :  { %v258_v54 = vpop.xlane.xlu1 %257 }
 0x38f   :  { %v259_v55 = vmul.f32 0.017857144, %v258_v54 }
 0x391   :  { %v260_v56 = vsub.f32 %v255_v52, %v259_v55 }
 0x393   :  { %v261_v57 = vmul.f32 %v260_v56, %v260_v56 }
 0x395   :  { %v262_v58 = vsel %vm138_vm4, %v261_v57, 0.0 }
 0x396   :  { %263 = vadd.xlane.f32.xlu1 %v262_v58 }
 0x41f   :  { %v264_v3 = vpop.xlane.xlu1 %263 }
 0x420   :  { %v265_v4 = vmul.f32 0.017857144, %v264_v3 }
 0x422   :  { %v266_v5 = vadd.f32 1e-05, %v265_v4 }
 0x424   :  { %467 = vrsqrt.f32 %v266_v5 }
 0x431   :  { %v468_v6 = vpop.eup %467 }
 0x432   :  { %v268_v8 = vmul.f32 %v468_v6, %v260_v56 }
 0x434   :  { %v273_v10 = vmul.f32 %v388_v7, %v268_v8 }
 0x436   :  { %v278_v11 = vadd.f32 %v389_v9, %v273_v10 }
 0x438   :  { %453 = vmatmul.mubr.msk.f32.vlgmr.msra.gmra.mxu0 %vm173_vm5, %v278_v11 }
 0x4f8   :  { %v359_v12 = vpop.f32.mrf.mxu0 }
 0x4f9   :  { %v360_v13 = vadd.f32 %v390_v0, %v359_v12 }
 0x4fa   :  { %v454_v14 = vpop.f32.mrf.mxu0 }
 0x4fb   :  { %364 = vst.msk [vmem:[#allocation5] sm:$0xf] %vm363_vm7, %v360_v13 }
 0x4fc   :  { %500 = shalt.err (!%p497_p9)
}
 0x4fd   :  { %374 = dma.vmem_to_hbm [thread:$0]  %s372_s14, 64, %s669_s5, [#allocation4]  }
 0x4fe   :  { %511 = dma.done.wait [#allocation4], 64  }
 0x4ff   :  { %512 = vsyncadd [#allocation4], 4294967232 }
 0x500   :  { %378 = vsyncpa [#allocation3], 1 }
 0x501   :  { %379 = vsyncpa [#allocation4], 1 }

</bundles_post_ra>
